<compile_context>
chip_gen: v7x
topology: tpu7x:2x2x1
jax: 0.10.0
libtpu: 0.0.40
codegen_flags: <defaults>
</compile_context>

<pallas_src>
import functools

import jax
import jax.numpy as jnp
from jax.experimental import pallas as pl
from jax.experimental.pallas import tpu as pltpu


def _mlp_kernel(xt_ref, w1_ref, b1_ref, w2_ref, b2_ref, w3_ref, b3_ref, o_ref):
    xt = xt_ref[...]                                            # (K0, TB) compute dtype
    # fc1: [128, K0] @ [K0, TB] -> [128, TB], f32 accumulation on the MXU.
    h1 = jnp.dot(w1_ref[...], xt, preferred_element_type=jnp.float32)
    h1 = jnp.maximum(h1 + b1_ref[...], 0.0)                     # bias (128,1) lane-broadcasts
    # dropout1: identity in eval mode.
    # fc2: [64, 128] @ [128, TB] -> [64, TB], f32 accumulation.
    h2 = jnp.dot(w2_ref[...], h1.astype(w2_ref.dtype),
                 preferred_element_type=jnp.float32)
    h2 = jnp.maximum(h2 + b2_ref[...], 0.0)
    # dropout2: identity in eval mode.
    # fc3 (64 -> 1) on the VPU/XLU: broadcast-multiply by the (64, 1) weight
    # column and reduce over the 64 feature sublanes -> lane-dense (1, TB) row.
    o_ref[...] = jnp.sum(w3_ref[...] * h2, axis=0, keepdims=True) + b3_ref[...]


def _round_up(x, m):
    return pl.cdiv(x, m) * m


@functools.partial(jax.jit, static_argnames=("compute_dtype", "block_b"))
def simple_nn_forward(x, params, *, compute_dtype=jnp.bfloat16, block_b=1024):
    """x: [B, input_size] float32.

    params (PyTorch-native layouts):
      w1: [128, input_size], b1: [128, 1]
      w2: [64, 128],         b2: [64, 1]
      w3: [64, 1] (fc3 weight pre-transposed once, host side), b3: [1, 1]
    Returns [B, 1] float32 (eval-mode forward: dropout = identity).
    """
    B, K0 = x.shape

    # Batch tile: large (up to block_b), multiple of 128 so the lane-dense
    # (1, TB) output block satisfies the (8, 128) tiling constraint.
    tb = max(128, min(int(block_b), int(_round_up(B, 128))))
    tb = int(_round_up(tb, 128))
    B_pad = int(_round_up(B, tb))

    x_pad = jnp.pad(x, ((0, B_pad - B), (0, 0))) if B_pad != B else x
    xt = x_pad.T.astype(compute_dtype)                 # (K0, B_pad), batch on lanes
    w1 = params["w1"].astype(compute_dtype)            # (128, K0)
    w2 = params["w2"].astype(compute_dtype)            # (64, 128)
    b1 = params["b1"].astype(jnp.float32)              # (128, 1)
    b2 = params["b2"].astype(jnp.float32)              # (64, 1)
    w3 = params["w3"].astype(jnp.float32)              # (64, 1)  -- tiny, keep f32
    b3 = params["b3"].astype(jnp.float32)              # (1, 1)

    grid = (B_pad // tb,)
    resident = lambda i: (0, 0)                        # weights/biases: never re-DMA'd

    operands = (xt, w1, b1, w2, b2, w3, b3)
    flops = 2 * B_pad * (K0 * 128 + 128 * 64 + 64 * 1)
    bytes_accessed = sum(int(a.size) * a.dtype.itemsize for a in operands) + B_pad * 4

    out = pl.pallas_call(
        _mlp_kernel,
        out_shape=jax.ShapeDtypeStruct((1, B_pad), jnp.float32),
        grid_spec=pltpu.PrefetchScalarGridSpec(
            num_scalar_prefetch=0,
            grid=grid,
            in_specs=[
                pl.BlockSpec((K0, tb), lambda i: (0, i)),   # x tile (batch on lanes)
                pl.BlockSpec((128, K0), resident),          # w1
                pl.BlockSpec((128, 1), resident),           # b1
                pl.BlockSpec((64, 128), resident),          # w2
                pl.BlockSpec((64, 1), resident),            # b2
                pl.BlockSpec((64, 1), resident),            # w3
                pl.BlockSpec((1, 1), resident),             # b3
            ],
            out_specs=pl.BlockSpec((1, tb), lambda i: (0, i)),
        ),
        compiler_params=pltpu.CompilerParams(
            dimension_semantics=("parallel",),
        ),
        cost_estimate=pl.CostEstimate(
            flops=int(flops), transcendentals=0, bytes_accessed=int(bytes_accessed)
        ),
    )(*operands)

    # Lane-dense (1, B_pad) slab -> (B, 1): pure layout plumbing in the wrapper.
    return out[0, :B].reshape(B, 1)


def init_params(key, input_size):
    """PyTorch-style uniform(-1/sqrt(fan_in)) init, weights in PyTorch's native
    [out, in] layout.  fc3's weight is stored pre-transposed as a (64, 1) column
    (done once, host side) so the kernel's VPU reduction needs no relayout."""
    def linear(key, fan_in, fan_out):
        kw, kb = jax.random.split(key)
        bound = 1.0 / jnp.sqrt(jnp.float32(fan_in))
        w = jax.random.uniform(kw, (fan_out, fan_in), jnp.float32, -bound, bound)
        b = jax.random.uniform(kb, (fan_out, 1), jnp.float32, -bound, bound)
        return w, b

    k1, k2, k3 = jax.random.split(key, 3)
    w1, b1 = linear(k1, input_size, 128)   # (128, in), (128, 1)
    w2, b2 = linear(k2, 128, 64)           # (64, 128), (64, 1)
    w3, b3 = linear(k3, 64, 1)             # (1, 64),  (1, 1)
    return {"w1": w1, "b1": b1, "w2": w2, "b2": b2, "w3": w3.T, "b3": b3}


if __name__ == "__main__":
    key = jax.random.PRNGKey(0)
    kx, kp = jax.random.split(key)

    batch, input_size = 300, 32            # non-multiple of the tile -> exercises padding
    x = jax.random.normal(kx, (batch, input_size), jnp.float32)
    params = init_params(kp, input_size)

    # Pure-JAX reference (eval-mode semantics: dropout = identity).
    h1 = jnp.maximum(x @ params["w1"].T + params["b1"].T, 0.0)
    h2 = jnp.maximum(h1 @ params["w2"].T + params["b2"].T, 0.0)
    y_ref = h2 @ params["w3"] + params["b3"].T

    # 1) f32 path with a small tile (128) -> multi-step grid, resident weights.
    y_f32 = simple_nn_forward(x, params, compute_dtype=jnp.float32, block_b=128)
    jax.block_until_ready(y_f32)
    assert y_f32.shape == (batch, 1)
    assert jnp.allclose(y_f32, y_ref, atol=1e-4, rtol=1e-4)

    # 2) Default fast path: bf16 matmul inputs, f32 accumulation, big tile.
    y_bf16 = simple_nn_forward(x, params)
    jax.block_until_ready(y_bf16)
    assert y_bf16.shape == (batch, 1)
    assert jnp.allclose(y_bf16, y_ref, atol=5e-2, rtol=5e-2)

    print("KERNEL_OK")
</pallas_src>

<mosaic_0001>
module attributes {stable_mosaic.version = 11 : i64} {
  func.func @_mlp_kernel(%arg0: i32, %arg1: memref<32x128xf32, #tpu.memory_space<vmem>>, %arg2: memref<128x32xf32, #tpu.memory_space<vmem>>, %arg3: memref<128x1xf32, #tpu.memory_space<vmem>>, %arg4: memref<64x128xf32, #tpu.memory_space<vmem>>, %arg5: memref<64x1xf32, #tpu.memory_space<vmem>>, %arg6: memref<64x1xf32, #tpu.memory_space<vmem>>, %arg7: memref<1x1xf32, #tpu.memory_space<vmem>>, %arg8: memref<1x128xf32, #tpu.memory_space<vmem>>) attributes {dimension_semantics = [#tpu.dimension_semantics<parallel>], iteration_bounds = array<i64: 3>, scalar_prefetch = 0 : i64, scratch_operands = 0 : i64, tpu.core_type = #tpu.core_type<tc>, window_params = [{transform_indices = @transform_0, window_bounds = array<i64: 32, 128>}, {pipeline_mode = #tpu.pipeline_mode<synchronous>, transform_indices = @transform_1, window_bounds = array<i64: 128, 32>}, {pipeline_mode = #tpu.pipeline_mode<synchronous>, transform_indices = @transform_2, window_bounds = array<i64: 128, 1>}, {pipeline_mode = #tpu.pipeline_mode<synchronous>, transform_indices = @transform_3, window_bounds = array<i64: 64, 128>}, {pipeline_mode = #tpu.pipeline_mode<synchronous>, transform_indices = @transform_4, window_bounds = array<i64: 64, 1>}, {pipeline_mode = #tpu.pipeline_mode<synchronous>, transform_indices = @transform_5, window_bounds = array<i64: 64, 1>}, {pipeline_mode = #tpu.pipeline_mode<synchronous>, transform_indices = @transform_6, window_bounds = array<i64: 1, 1>}, {transform_indices = @transform_7, window_bounds = array<i64: 1, 128>}]} {
    %c0 = arith.constant 0 : index
    %c0_0 = arith.constant 0 : index
    %0 = vector.load %arg1[%c0, %c0_0] : memref<32x128xf32, #tpu.memory_space<vmem>>, vector<32x128xf32>
    %c0_1 = arith.constant 0 : index
    %c0_2 = arith.constant 0 : index
    %1 = vector.load %arg2[%c0_1, %c0_2] : memref<128x32xf32, #tpu.memory_space<vmem>>, vector<128x32xf32>
    %cst = arith.constant dense<0.000000e+00> : vector<128x128xf32>
    %2 = tpu.matmul %1, %0, %cst {dimension_numbers = #tpu.dot_dimension_numbers<[1], [0], [0], [1], [0, 0, 1, 1], [], []>} : vector<128x32xf32>, vector<32x128xf32>, vector<128x128xf32> -> vector<128x128xf32>
    %c0_3 = arith.constant 0 : index
    %c0_4 = arith.constant 0 : index
    %3 = vector.load %arg3[%c0_3, %c0_4] : memref<128x1xf32, #tpu.memory_space<vmem>>, vector<128x1xf32>
    %4 = vector.broadcast %3 : vector<128x1xf32> to vector<128x128xf32>
    %5 = arith.addf %2, %4 : vector<128x128xf32>
    %cst_5 = arith.constant 0.000000e+00 : f32
    %6 = vector.broadcast %cst_5 : f32 to vector<128x128xf32>
    %7 = arith.maximumf %5, %6 : vector<128x128xf32>
    %c0_6 = arith.constant 0 : index
    %c0_7 = arith.constant 0 : index
    %8 = vector.load %arg4[%c0_6, %c0_7] : memref<64x128xf32, #tpu.memory_space<vmem>>, vector<64x128xf32>
    %cst_8 = arith.constant dense<0.000000e+00> : vector<64x128xf32>
    %9 = tpu.matmul %8, %7, %cst_8 {dimension_numbers = #tpu.dot_dimension_numbers<[1], [0], [0], [1], [0, 0, 1, 1], [], []>} : vector<64x128xf32>, vector<128x128xf32>, vector<64x128xf32> -> vector<64x128xf32>
    %c0_9 = arith.constant 0 : index
    %c0_10 = arith.constant 0 : index
    %10 = vector.load %arg5[%c0_9, %c0_10] : memref<64x1xf32, #tpu.memory_space<vmem>>, vector<64x1xf32>
    %11 = vector.broadcast %10 : vector<64x1xf32> to vector<64x128xf32>
    %12 = arith.addf %9, %11 : vector<64x128xf32>
    %cst_11 = arith.constant 0.000000e+00 : f32
    %13 = vector.broadcast %cst_11 : f32 to vector<64x128xf32>
    %14 = arith.maximumf %12, %13 : vector<64x128xf32>
    %c0_12 = arith.constant 0 : index
    %c0_13 = arith.constant 0 : index
    %15 = vector.load %arg6[%c0_12, %c0_13] : memref<64x1xf32, #tpu.memory_space<vmem>>, vector<64x1xf32>
    %16 = vector.broadcast %15 : vector<64x1xf32> to vector<64x128xf32>
    %17 = arith.mulf %16, %14 : vector<64x128xf32>
    %cst_14 = arith.constant dense<0.000000e+00> : vector<128xf32>
    %18 = vector.multi_reduction <add>, %17, %cst_14 [0] : vector<64x128xf32> to vector<128xf32>
    %19 = vector.shape_cast %18 : vector<128xf32> to vector<1x128xf32>
    %c0_15 = arith.constant 0 : index
    %c0_16 = arith.constant 0 : index
    %20 = vector.load %arg7[%c0_15, %c0_16] : memref<1x1xf32, #tpu.memory_space<vmem>>, vector<1x1xf32>
    %21 = vector.broadcast %20 : vector<1x1xf32> to vector<1x128xf32>
    %22 = arith.addf %19, %21 : vector<1x128xf32>
    %c0_17 = arith.constant 0 : index
    %c0_18 = arith.constant 0 : index
    %23 = vector.load %arg8[%c0_17, %c0_18] : memref<1x128xf32, #tpu.memory_space<vmem>>, vector<1x128xf32>
    tpu.vector_store %arg8[%c0_17, %c0_18], %22 {strides = array<i32>} : memref<1x128xf32, #tpu.memory_space<vmem>>, vector<1x128xf32>,
    return
  }
  func.func @transform_0(%arg0: i32) -> (i32, i32) {
    %c0_i32 = arith.constant 0 : i32
    %c0_i32_0 = arith.constant 0 : i32
    return %c0_i32, %arg0 : i32, i32
  }
  func.func @transform_1(%arg0: i32) -> (i32, i32) {
    %c0_i32 = arith.constant 0 : i32
    %c0_i32_0 = arith.constant 0 : i32
    %c0_i32_1 = arith.constant 0 : i32
    return %c0_i32, %c0_i32_0 : i32, i32
  }
  func.func @transform_2(%arg0: i32) -> (i32, i32) {
    %c0_i32 = arith.constant 0 : i32
    %c0_i32_0 = arith.constant 0 : i32
    %c0_i32_1 = arith.constant 0 : i32
    return %c0_i32, %c0_i32_0 : i32, i32
  }
  func.func @transform_3(%arg0: i32) -> (i32, i32) {
    %c0_i32 = arith.constant 0 : i32
    %c0_i32_0 = arith.constant 0 : i32
    %c0_i32_1 = arith.constant 0 : i32
    return %c0_i32, %c0_i32_0 : i32, i32
  }
  func.func @transform_4(%arg0: i32) -> (i32, i32) {
    %c0_i32 = arith.constant 0 : i32
    %c0_i32_0 = arith.constant 0 : i32
    %c0_i32_1 = arith.constant 0 : i32
    return %c0_i32, %c0_i32_0 : i32, i32
  }
  func.func @transform_5(%arg0: i32) -> (i32, i32) {
    %c0_i32 = arith.constant 0 : i32
    %c0_i32_0 = arith.constant 0 : i32
    %c0_i32_1 = arith.constant 0 : i32
    return %c0_i32, %c0_i32_0 : i32, i32
  }
  func.func @transform_6(%arg0: i32) -> (i32, i32) {
    %c0_i32 = arith.constant 0 : i32
    %c0_i32_0 = arith.constant 0 : i32
    %c0_i32_1 = arith.constant 0 : i32
    return %c0_i32, %c0_i32_0 : i32, i32
  }
  func.func @transform_7(%arg0: i32) -> (i32, i32) {
    %c0_i32 = arith.constant 0 : i32
    %c0_i32_0 = arith.constant 0 : i32
    return %c0_i32, %arg0 : i32, i32
  }
}

</mosaic_0001>

<bundles_post_ra>
// kernel: simple_nn_forward.1
= control target key start
LH: loop header
LB: loop body
LE: loop exit
PB: predicated region body
PF: predicated region fallthrough
CT: control target
= control target key end

     0   :  { %s1487_s0 = inlined_call_operand.vmem [shape: f32[32,384], index: 0, kind: input, shape index: {}]   ;;  %s1488_s1 = inlined_call_operand.vmem [shape: f32[128,32], index: 1, kind: input, shape index: {}]   ;;  %s1489_s2 = inlined_call_operand.vmem [shape: f32[128,1], index: 2, kind: input, shape index: {}]   ;;  %s1490_s3 = inlined_call_operand.vmem [shape: f32[64,128], index: 3, kind: input, shape index: {}]   ;;  %s1491_s4 = inlined_call_operand.vmem [shape: f32[64,1], index: 4, kind: input, shape index: {}]   ;;  %s1492_s5 = inlined_call_operand.vmem [shape: f32[64,1], index: 5, kind: input, shape index: {}]   ;;  %s1493_s6 = inlined_call_operand.<no memory space> [shape: f32[1,1], index: 6, kind: input, shape index: {}]   ;;  %s1494_s7 = inlined_call_operand.vmem [shape: f32[1,384], index: 7, kind: output, shape index: {}]  }
   0x1   :  { %v12_v0 = vstv %s1493_s6 }
   0x2   :  { %13 = vst [vmem:[#allocation2] sm:$0x1] %v12_v0 }
   0x3   :  { %s1249_s26 = smov 0   ;;  %s1251_s27 = smov 0  }
   0x4   :  { %s1253_s28 = smov 0  }
   0x5 LB: > { %s952_s6 = sadd.s32 4294967295, %s1203_s28   ;;  %s1266_s29 = sadd.s32 1, %s1203_s28   ;;  %s1203_s28 = sphi %s1253_s28, %s1497_s28   ;;  %s1199_s27 = sphi %s1251_s27, %s1496_s27   ;;  %s1195_s26 = sphi %s1249_s26, %s1495_s26  }
   0x6   : > { %s23_s30 = ssub.s32 %s1203_s28, %s1266_s29  ;;  %s26_s8 = sadd.s32 1, %s1199_s27 }
   0x7   : > { %p24_p0 = scmp.eq.s32.totalorder %s23_s30, 0  ;;  %p33_p1 = scmp.ne.s32.totalorder %s1199_s27, %s1195_s26 }
   0x8   : > { %p34_p2 = scmp.eq.s32.totalorder %s1203_s28, 0  ;;  %p955_p4 = scmp.ge.s32.totalorder %s1203_s28, 3 }
   0x9   : > { %s1275_s9 = scalar_select %p24_p0, %s1199_s27, %s26_s8  }
   0xa   : > { %p35_p3 = por %p34_p2, %p33_p1  ;;  %229 = sbr.rel (%p955_p4) target bundleno = 24 (0x18), region = 40 }
  0x11   : > { %232 = sbr.rel (!%p35_p3) target bundleno = 24 (0x18), region = 44  ;;  %s234_s10 = sand.u32 (%p35_p3), 1, %s1199_s27  }
  0x12   : > { %s957_s11 = sshll.u32 (%p35_p3), %s1203_s28, 3  ;;  %s956_s12 = sshll.u32 (%p35_p3), %s234_s10, 5 }
  0x13   : > { %s238_s15 = scalar_lea.vmem (%p35_p3), %s1487_s0, %s957_s11  ;;  %s236_s16 = scalar_lea.vmem (%p35_p3), [#allocation3], %s956_s12 }
  0x14   : > { %v272_v1 = vld [vmem:[%s238_s15] sm:$0xff] (%p35_p3)  ;;  %v274_v2 = vld [vmem:[%s238_s15 + $0x18] sm:$0xff] (%p35_p3)  ;;  %v276_v3 = vld [vmem:[%s238_s15 + $0x30] sm:$0xff] (%p35_p3) }
  0x15   : > { %273 = vst [vmem:[%s236_s16] sm:$0xff] (%p35_p3), %v272_v1  ;;  %275 = vst [vmem:[%s236_s16 + $0x8] sm:$0xff] (%p35_p3), %v274_v2  ;;  %v278_v4 = vld [vmem:[%s238_s15 + $0x48] sm:$0xff] (%p35_p3) }
  0x16   : > { %277 = vst [vmem:[%s236_s16 + $0x10] sm:$0xff] (%p35_p3), %v276_v3  ;;  %279 = vst [vmem:[%s236_s16 + $0x18] sm:$0xff] (%p35_p3), %v278_v4 }
  0x18 PF: > { %p958_p5 = scmp.ge.s32.totalorder %s1203_s28, 1  ;;  %p284_p6 = scmp.lt.s32.totalorder %s1203_s28, 4 }
  0x1a   : > { %p285_p7 = pnand %p958_p5, %p284_p6 }
  0x1b   : > { %s291_s17 = sand.u32 (!%p285_p7), 1, %s1195_s26   ;;  %v327_v5 = vld [vmem:[%s1488_s1] sm:$0xff] (!%p285_p7)  ;;  %vm439_vm0 = vcmask (!%p285_p7), 261120   ;;  %v1205_v6 = vmov (!%p285_p7), 0   ;;  %v344_v14 = vld [vmem:[%s1489_s2 + $0x8] sm:$0xff] (!%p285_p7)  ;;  %v345_v15 = vld [vmem:[%s1489_s2 + $0x10] sm:$0xff] (!%p285_p7) }
  0x1c   : > { %288 = sbr.rel (%p285_p7) target bundleno = 540 (0x21c), region = 82  ;;  %s959_s20 = sshll.u32 (!%p285_p7), %s291_s17, 5  ;;  %1030 = vmatprep.mubr.msk.f32.mxu0 (!%p285_p7), %vm439_vm0, %v327_v5  ;;  %1179 = vset.pattern.permute.xlu0 (!%p285_p7), %v1205_v6  ;;  %v343_v12 = vld [vmem:[%s1489_s2] sm:$0xff] (!%p285_p7)  ;;  %v346_v16 = vld [vmem:[%s1489_s2 + $0x18] sm:$0xff] (!%p285_p7)  ;;  %v328_v18 = vld [vmem:[%s1488_s1 + $0x8] sm:$0xff] (!%p285_p7) }
  0x1d   : > { %1180 = vset.pattern.permute.xlu1 (!%p285_p7), %v1205_v6  ;;  %s293_s21 = scalar_lea.vmem (!%p285_p7), [#allocation3], %s959_s20  ;;  %361 = vperm.xlu0 (!%p285_p7), %1179, %v343_v12   ;;  %v347_v17 = vld [vmem:[%s1489_s2 + $0x20] sm:$0xff] (!%p285_p7)  ;;  %v329_v19 = vld [vmem:[%s1488_s1 + $0x10] sm:$0xff] (!%p285_p7)  ;;  %v348_v20 = vld [vmem:[%s1489_s2 + $0x28] sm:$0xff] (!%p285_p7)  ;;  %p320_p8 = scmp.lt.s32.totalorder (!%p285_p7), %s952_s6, 2 }
  0x1e   : > { %v323_v7 = vld [vmem:[%s293_s21] sm:$0xff] (!%p285_p7)  ;;  %v324_v8 = vld [vmem:[%s293_s21 + $0x8] sm:$0xff] (!%p285_p7)  ;;  %v325_v9 = vld [vmem:[%s293_s21 + $0x10] sm:$0xff] (!%p285_p7)  ;;  %371 = vperm.xlu1 (!%p285_p7), %1180, %v345_v15  }
  0x1f   : > { %v1098_v10 = vpack.c.bf16 (!%p285_p7), %v324_v8, %v323_v7  ;;  %v326_v11 = vld [vmem:[%s293_s21 + $0x18] sm:$0xff] (!%p285_p7)  ;;  %v349_v21 = vld [vmem:[%s1489_s2 + $0x30] sm:$0xff] (!%p285_p7)  ;;  %v332_v26 = vld [vmem:[%s1488_s1 + $0x28] sm:$0xff] (!%p285_p7) }
  0x20   : > { %v1102_v13 = vpack.c.bf16 (!%p285_p7), %v326_v11, %v325_v9  ;;  %v330_v22 = vld [vmem:[%s1488_s1 + $0x18] sm:$0xff] (!%p285_p7)  ;;  %v331_v23 = vld [vmem:[%s1488_s1 + $0x20] sm:$0xff] (!%p285_p7)  ;;  %v333_v27 = vld [vmem:[%s1488_s1 + $0x30] sm:$0xff] (!%p285_p7) }
  0x21   : > { %1099 = vmatprep.subr.bf16.mxu0 (!%p285_p7), %v1098_v10  ;;  %366 = vperm.xlu0 (!%p285_p7), %1179, %v344_v14   ;;  %v350_v24 = vld [vmem:[%s1489_s2 + $0x38] sm:$0xff] (!%p285_p7)  ;;  %v351_v25 = vld [vmem:[%s1489_s2 + $0x40] sm:$0xff] (!%p285_p7)  ;;  %v352_v28 = vld [vmem:[%s1489_s2 + $0x48] sm:$0xff] (!%p285_p7) }
  0x22   : > { %1101 = vmatpush3.bf16.msra.mxu0 (!%p285_p7), %v1098_v10  ;;  %376 = vperm.xlu1 (!%p285_p7), %1180, %v346_v16   ;;  %v353_v29 = vld [vmem:[%s1489_s2 + $0x50] sm:$0xff] (!%p285_p7)  ;;  %v334_v30 = vld [vmem:[%s1488_s1 + $0x38] sm:$0xff] (!%p285_p7)  ;;  %v335_v31 = vld [vmem:[%s1488_s1 + $0x40] sm:$0xff] (!%p285_p7) }
  0x23   : > { %1103 = vmatprep.subr.bf16.mxu0 %v1102_v13  ;;  %v354_v32 = vld [vmem:[%s1489_s2 + $0x58] sm:$0xff]  ;;  %v355_v33 = vld [vmem:[%s1489_s2 + $0x60] sm:$0xff]  ;;  %v336_v34 = vld [vmem:[%s1488_s1 + $0x48] sm:$0xff]  ;;  %s1499_s6 = smov (!%p320_p8, %s952_s6), 2 }
  0x24   : > { %v337_v35 = vld [vmem:[%s1488_s1 + $0x50] sm:$0xff]  ;;  %v356_v36 = vld [vmem:[%s1489_s2 + $0x68] sm:$0xff]  ;;  %v338_v38 = vld [vmem:[%s1488_s1 + $0x58] sm:$0xff]  ;;  %s322_s20 = scalar_lea.vmem %s1494_s7, %s1499_s6 }
  0x25   : > { %381 = vperm.xlu0 %1179, %v347_v17   ;;  %v357_v37 = vld [vmem:[%s1489_s2 + $0x70] sm:$0xff]  ;;  %v339_v39 = vld [vmem:[%s1488_s1 + $0x60] sm:$0xff]  ;;  %v358_v40 = vld [vmem:[%s1489_s2 + $0x78] sm:$0xff] }
  0x26   : > { %1105 = vmatpush3.bf16.msra.mxu0 %v1102_v13  ;;  %386 = vperm.xlu1 %1180, %v348_v20   ;;  %v657_v41 = vld [vmem:[%s1491_s4] sm:$0xff]  ;;  %v340_v42 = vld [vmem:[%s1488_s1 + $0x68] sm:$0xff]  ;;  %v341_v43 = vld [vmem:[%s1488_s1 + $0x70] sm:$0xff] }
  0x27   : > { %v658_v44 = vld [vmem:[%s1491_s4 + $0x8] sm:$0xff]  ;;  %v659_v45 = vld [vmem:[%s1491_s4 + $0x10] sm:$0xff]  ;;  %v342_v46 = vld [vmem:[%s1488_s1 + $0x78] sm:$0xff] }
  0x28   : > { %v660_v47 = vld [vmem:[%s1491_s4 + $0x18] sm:$0xff]  ;;  %v818_v48 = vld [vmem:[%s1492_s5] sm:$0xff]  ;;  %v819_v49 = vld [vmem:[%s1492_s5 + $0x8] sm:$0xff] }
  0x29   : > { %1031 = vmatmul.mubr.msk.f32.vlgmr.msra.gmra.mrb[0].mxu0 %vm439_vm0, %v328_v18  ;;  %391 = vperm.xlu0 %1179, %v349_v21   ;;  %v661_v50 = vld [vmem:[%s1491_s4 + $0x20] sm:$0xff]  ;;  %v820_v51 = vld [vmem:[%s1492_s5 + $0x10] sm:$0xff]  ;;  %v662_v52 = vld [vmem:[%s1491_s4 + $0x28] sm:$0xff] }
  0x2a   : > { %1033 = vmatprep.mubr.msk.f32.mxu0 %vm439_vm0, %v329_v19  ;;  %396 = vperm.xlu1 %1180, %v350_v24   ;;  %v821_v53 = vld [vmem:[%s1492_s5 + $0x18] sm:$0xff]  ;;  %v663_v54 = vld [vmem:[%s1491_s4 + $0x30] sm:$0xff]  ;;  %v822_v55 = vld [vmem:[%s1492_s5 + $0x20] sm:$0xff] }
  0x2b   : > { %v664_v56 = vld [vmem:[%s1491_s4 + $0x38] sm:$0xff]  ;;  %v823_v57 = vld [vmem:[%s1492_s5 + $0x28] sm:$0xff]  ;;  %v824_v58 = vld [vmem:[%s1492_s5 + $0x30] sm:$0xff] }
  0x2c   : > { %v825_v59 = vld [vmem:[%s1492_s5 + $0x38] sm:$0xff]  ;;  %v887_v60 = vld [vmem:[#allocation2] sm:$0x1]  ;;  %v651_v62 = vld [vmem:[%s1490_s3 + $0x10] sm:$0xff] }
  0x2d   : > { %1034 = vmatmul.mubr.msk.f32.gmra.mrb[2].mxu0 %vm439_vm0, %v330_v22  ;;  %401 = vperm.xlu0 %1179, %v351_v25   ;;  %v649_v61 = vld [vmem:[%s1490_s3] sm:$0xff] }
  0x2e   : > { %1036 = vmatprep.mubr.msk.f32.mxu0 %vm439_vm0, %v331_v23  ;;  %406 = vperm.xlu1 %1180, %v352_v28  }
  0x2f   : > { %1089 = vmatprep.mubr.f32.mxu1 %v651_v62 }
  0x31   : > { %1037 = vmatmul.mubr.msk.f32.gmra.mrb[4].mxu0 %vm439_vm0, %v332_v26  ;;  %411 = vperm.xlu0 %1179, %v353_v29  }
  0x32   : > { %1039 = vmatprep.mubr.msk.f32.mxu0 %vm439_vm0, %v333_v27  ;;  %416 = vperm.xlu1 %1180, %v354_v32  }
  0x35   : > { %1040 = vmatmul.mubr.msk.f32.gmra.mrb[6].mxu0 %vm439_vm0, %v334_v30  ;;  %421 = vperm.xlu0 %1179, %v355_v33  }
  0x36   : > { %1042 = vmatprep.mubr.msk.f32.mxu0 %vm439_vm0, %v335_v31  ;;  %426 = vperm.xlu1 %1180, %v356_v36  }
  0x39   : > { %1043 = vmatmul.mubr.msk.f32.gmra.mrb[8].mxu0 %vm439_vm0, %v336_v34  ;;  %431 = vperm.xlu0 %1179, %v357_v37  }
  0x3a   : > { %1045 = vmatprep.mubr.msk.f32.mxu0 %vm439_vm0, %v337_v35  ;;  %436 = vperm.xlu1 %1180, %v358_v40  }
  0x3d   : > { %1046 = vmatmul.mubr.msk.f32.gmra.mrb[10].mxu0 %vm439_vm0, %v338_v38  ;;  %667 = vperm.xlu0 %1179, %v657_v41  }
  0x3e   : > { %1048 = vmatprep.mubr.msk.f32.mxu0 %vm439_vm0, %v339_v39  ;;  %672 = vperm.xlu1 %1180, %v658_v44  }
  0x41   : > { %1049 = vmatmul.mubr.msk.f32.gmra.mrb[12].mxu0 %vm439_vm0, %v340_v42  ;;  %677 = vperm.xlu0 %1179, %v659_v45  }
  0x42   : > { %1051 = vmatprep.mubr.msk.f32.mxu0 %vm439_vm0, %v341_v43  ;;  %682 = vperm.xlu1 %1180, %v660_v47  }
  0x45   : > { %1052 = vmatmul.mubr.msk.f32.gmra.mrb[14].mxu0 %vm439_vm0, %v342_v46  ;;  %828 = vperm.xlu0 %1179, %v818_v48  }
  0x46   : > { %833 = vperm.xlu1 %1180, %v819_v49   ;;  %1086 = vmatprep.mubr.f32.mxu0 %v649_v61 }
  0x49   : > { %687 = vperm.xlu0 %1179, %v661_v50  }
  0x4a   : > { %838 = vperm.xlu1 %1180, %v820_v51  }
  0x4d   : > { %692 = vperm.xlu0 %1179, %v662_v52  }
  0x4e   : > { %843 = vperm.xlu1 %1180, %v821_v53  }
  0x51   : > { %697 = vperm.xlu0 %1179, %v663_v54  }
  0x52   : > { %848 = vperm.xlu1 %1180, %v822_v55  }
  0x55   : > { %702 = vperm.xlu0 %1179, %v664_v56  }
  0x56   : > { %853 = vperm.xlu1 %1180, %v823_v57  }
  0x59   : > { %858 = vperm.xlu0 %1179, %v824_v58  }
  0x5a   : > { %863 = vperm.xlu1 %1180, %v825_v59  }
  0x5d   : > { %890 = vperm.xlu0 %1179, %v887_v60  }
  0x9c   : > { %v362_v0 = vpop.permute.xlu0 %361 }
  0x9d   : > { %v372_v63 = vpop.permute.xlu1 %371 }
  0xa0   : > { %v367_v2 = vpop.permute.xlu0 %366 }
  0xa1   : > { %v377_v1 = vpop.permute.xlu1 %376 }
  0xa4   : > { %v382_v4 = vpop.permute.xlu0 %381 }
  0xa5   : > { %v387_v3 = vpop.permute.xlu1 %386 }
  0xa8   : > { %v392_v13 = vpop.permute.xlu0 %391 }
  0xa9   : > { %v397_v10 = vpop.permute.xlu1 %396 }
  0xac   : > { %v402_v26 = vpop.permute.xlu0 %401 }
  0xad   : > { %v407_v23 = vpop.permute.xlu1 %406 }
  0xb0   : > { %v412_v38 = vpop.permute.xlu0 %411 }
  0xb1   : > { %v417_v35 = vpop.permute.xlu1 %416 }
  0xb4   : > { %v422_v51 = vpop.permute.xlu0 %421 }
  0xb5   : > { %v427_v48 = vpop.permute.xlu1 %426 }
  0xb9   : > { %v437_v60 = vpop.permute.xlu1 %436 }
  0xfc   : > { %v1032_v5 = vpop.f32.mrb[0].mxu0 }
  0xfd   : > { %v560_v6 = vadd.f32 %v1032_v5, %v367_v2  ;;  %v554_v7 = vpop.f32.mrb[1].mxu0 }
  0xfe   : > { %v555_v8 = vadd.f32 %v554_v7, %v362_v0  ;;  %v650_v7 = vld [vmem:[%s1490_s3 + $0x8] sm:$0xff] }
  0xff   : > { %v634_v9 = vmax.f32 %v560_v6, 0.0 }
 0x100   : > { %v633_v11 = vmax.f32 %v555_v8, 0.0  ;;  %v1035_v12 = vpop.f32.mrb[2].mxu0  ;;  %v652_v8 = vld [vmem:[%s1490_s3 + $0x18] sm:$0xff] }
 0x101   : > { %v570_v14 = vadd.f32 %v1035_v12, %v377_v1  ;;  %v564_v15 = vpop.f32.mrb[3].mxu0  ;;  %v656_v12 = vld [vmem:[%s1490_s3 + $0x38] sm:$0xff] }
 0x102   : > { %v1106_v16 = vpack.c.bf16 %v634_v9, %v633_v11  ;;  %v565_v17 = vadd.f32 %v564_v15, %v372_v63  ;;  %v432_v63 = vpop.permute.xlu0 %431  ;;  %v653_v9 = vld [vmem:[%s1490_s3 + $0x20] sm:$0xff]  ;;  %v655_v11 = vld [vmem:[%s1490_s3 + $0x30] sm:$0xff] }
 0x103   : > { %v636_v18 = vmax.f32 %v570_v14, 0.0  ;;  %v673_v14 = vpop.permute.xlu1 %672 }
 0x104   : > { %v635_v19 = vmax.f32 %v565_v17, 0.0  ;;  %v1038_v20 = vpop.f32.mrb[4].mxu0  ;;  %1107 = vmatprep.subr.bf16.mxu0 %v1106_v16  ;;  %1138 = vmatprep.subr.bf16.mxu1 %v1106_v16 }
 0x105   : > { %v580_v21 = vadd.f32 %v1038_v20, %v387_v3  ;;  %v574_v22 = vpop.f32.mrb[5].mxu0  ;;  %1109 = vmatpush3.bf16.msra.mxu0 %v1106_v16  ;;  %1146 = vmatpush3.bf16.msra.mxu1 %v1106_v16 }
 0x106   : > { %v1110_v24 = vpack.c.bf16 %v636_v18, %v635_v19  ;;  %v575_v25 = vadd.f32 %v574_v22, %v382_v4 }
 0x107   : > { %v638_v27 = vmax.f32 %v580_v21, 0.0  ;;  %v683_v16 = vpop.permute.xlu1 %682 }
 0x108   : > { %v637_v28 = vmax.f32 %v575_v25, 0.0  ;;  %v1041_v29 = vpop.f32.mrb[6].mxu0  ;;  %1111 = vmatprep.subr.bf16.mxu0 %v1110_v24  ;;  %1139 = vmatprep.subr.bf16.mxu1 %v1110_v24 }
 0x109   : > { %v590_v30 = vadd.f32 %v1041_v29, %v397_v10  ;;  %v584_v31 = vpop.f32.mrb[7].mxu0  ;;  %1113 = vmatpush3.bf16.msra.mxu0 %v1110_v24  ;;  %1147 = vmatpush3.bf16.msra.mxu1 %v1110_v24  ;;  %v654_v10 = vld [vmem:[%s1490_s3 + $0x28] sm:$0xff] }
 0x10a   : > { %v1114_v32 = vpack.c.bf16 %v638_v27, %v637_v28  ;;  %v585_v33 = vadd.f32 %v584_v31, %v392_v13  ;;  %v668_v13 = vpop.permute.xlu0 %667 }
 0x10b   : > { %v640_v34 = vmax.f32 %v590_v30, 0.0  ;;  %v834_v18 = vpop.permute.xlu1 %833 }
 0x10c   : > { %v639_v36 = vmax.f32 %v585_v33, 0.0  ;;  %v1044_v37 = vpop.f32.mrb[8].mxu0  ;;  %1115 = vmatprep.subr.bf16.mxu0 %v1114_v32  ;;  %1140 = vmatprep.subr.bf16.mxu1 %v1114_v32 }
 0x10d   : > { %v600_v39 = vadd.f32 %v1044_v37, %v407_v23  ;;  %v594_v40 = vpop.f32.mrb[9].mxu0  ;;  %1117 = vmatpush3.bf16.msra.mxu0 %v1114_v32  ;;  %1148 = vmatpush3.bf16.msra.mxu1 %v1114_v32 }
 0x10e   : > { %v1118_v41 = vpack.c.bf16 %v640_v34, %v639_v36  ;;  %v595_v42 = vadd.f32 %v594_v40, %v402_v26  ;;  %v678_v15 = vpop.permute.xlu0 %677 }
 0x10f   : > { %v642_v43 = vmax.f32 %v600_v39, 0.0  ;;  %v839_v20 = vpop.permute.xlu1 %838 }
 0x110   : > { %v641_v44 = vmax.f32 %v595_v42, 0.0  ;;  %v1047_v45 = vpop.f32.mrb[10].mxu0  ;;  %1119 = vmatprep.subr.bf16.mxu0 %v1118_v41  ;;  %1141 = vmatprep.subr.bf16.mxu1 %v1118_v41 }
 0x111   : > { %v610_v46 = vadd.f32 %v1047_v45, %v417_v35  ;;  %v604_v47 = vpop.f32.mrb[11].mxu0  ;;  %1121 = vmatpush3.bf16.msra.mxu0 %v1118_v41  ;;  %1149 = vmatpush3.bf16.msra.mxu1 %v1118_v41 }
 0x112   : > { %v1122_v49 = vpack.c.bf16 %v642_v43, %v641_v44  ;;  %v605_v50 = vadd.f32 %v604_v47, %v412_v38  ;;  %v829_v17 = vpop.permute.xlu0 %828 }
 0x113   : > { %v644_v52 = vmax.f32 %v610_v46, 0.0  ;;  %v844_v22 = vpop.permute.xlu1 %843 }
 0x114   : > { %v643_v53 = vmax.f32 %v605_v50, 0.0  ;;  %v1050_v54 = vpop.f32.mrb[12].mxu0  ;;  %1123 = vmatprep.subr.bf16.mxu0 %v1122_v49  ;;  %1142 = vmatprep.subr.bf16.mxu1 %v1122_v49 }
 0x115   : > { %v620_v55 = vadd.f32 %v1050_v54, %v427_v48  ;;  %v614_v56 = vpop.f32.mrb[13].mxu0  ;;  %1125 = vmatpush3.bf16.msra.mxu0 %v1122_v49  ;;  %1150 = vmatpush3.bf16.msra.mxu1 %v1122_v49 }
 0x116   : > { %v1126_v57 = vpack.c.bf16 %v644_v52, %v643_v53  ;;  %v615_v58 = vadd.f32 %v614_v56, %v422_v51  ;;  %v688_v19 = vpop.permute.xlu0 %687 }
 0x117   : > { %v646_v59 = vmax.f32 %v620_v55, 0.0  ;;  %v849_v36 = vpop.permute.xlu1 %848 }
 0x118   : > { %v645_v61 = vmax.f32 %v615_v58, 0.0  ;;  %v1053_v62 = vpop.f32.mrb[14].mxu0  ;;  %1127 = vmatprep.subr.bf16.mxu0 %v1126_v57  ;;  %1143 = vmatprep.subr.bf16.mxu1 %v1126_v57 }
 0x119   : > { %v630_v0 = vadd.f32 %v1053_v62, %v437_v60  ;;  %v624_v1 = vpop.f32.mrb[15].mxu0  ;;  %1129 = vmatpush3.bf16.msra.mxu0 %v1126_v57  ;;  %1151 = vmatpush3.bf16.msra.mxu1 %v1126_v57 }
 0x11a   : > { %v1130_v2 = vpack.c.bf16 %v646_v59, %v645_v61  ;;  %v625_v3 = vadd.f32 %v624_v1, %v432_v63  ;;  %v693_v21 = vpop.permute.xlu0 %692 }
 0x11b   : > { %v648_v4 = vmax.f32 %v630_v0, 0.0  ;;  %v854_v54 = vpop.permute.xlu1 %853 }
 0x11c   : > { %v647_v5 = vmax.f32 %v625_v3, 0.0  ;;  %1131 = vmatprep.subr.bf16.mxu0 %v1130_v2  ;;  %1144 = vmatprep.subr.bf16.mxu1 %v1130_v2  ;;  %v893_v3 = vlaneseq }
 0x11d   : > { %1133 = vmatpush3.bf16.msra.mxu0 %v1130_v2  ;;  %1152 = vmatpush3.bf16.msra.mxu1 %v1130_v2 }
 0x11e   : > { %v1134_v6 = vpack.c.bf16 %v648_v4, %v647_v5  ;;  %v698_v31 = vpop.permute.xlu0 %697 }
 0x11f   : > { %v864_v0 = vpop.permute.xlu1 %863 }
 0x120   : > { %1135 = vmatprep.subr.bf16.mxu0 %v1134_v6  ;;  %1145 = vmatprep.subr.bf16.mxu1 %v1134_v6 }
 0x121   : > { %1137 = vmatpush3.bf16.msra.mxu0 %v1134_v6  ;;  %1153 = vmatpush3.bf16.msra.mxu1 %v1134_v6  ;;  %v894_v6 = vshrl.u32 %v893_v3, 7 }
 0x122   : > { %v703_v47 = vpop.permute.xlu0 %702 }
 0x124   : > { %1087 = vmatmul.mubr.f32.vlgmr.msra.gmra.mrb[16].mxu0 %v650_v7  ;;  %1090 = vmatmul.mubr.f32.vlgmr.msra.gmra.mrb[0].mxu1 %v652_v8 }
 0x125   : > { %1092 = vmatprep.mubr.f32.mxu1 %v653_v9  ;;  %v895_v9 = vsub.s32 0, %v894_v6 }
 0x126   : > { %v859_v61 = vpop.permute.xlu0 %858 }
 0x128   : > { %1093 = vmatmul.mubr.f32.gmra.mrb[2].mxu1 %v654_v10 }
 0x129   : > { %1095 = vmatprep.mubr.f32.mxu1 %v655_v11 }
 0x12a   : > { %v891_v11 = vpop.permute.xlu0 %890 }
 0x12c   : > { %1096 = vmatmul.mubr.f32.gmra.mrb[4].mxu1 %v656_v12 }
 0x1f7   : > { %v1088_v23 = vpop.f32.mrb[16].mxu0  ;;  %v1091_v24 = vpop.f32.mrb[0].mxu1 }
 0x1f8   : > { %v777_v25 = vadd.f32 %v1088_v23, %v673_v14  ;;  %v787_v26 = vadd.f32 %v1091_v24, %v683_v16  ;;  %v771_v27 = vpop.f32.mrb[17].mxu0  ;;  %v781_v28 = vpop.f32.mrb[1].mxu1 }
 0x1f9   : > { %v772_v29 = vadd.f32 %v771_v27, %v668_v13  ;;  %v782_v30 = vadd.f32 %v781_v28, %v678_v15  ;;  %v896_v13 = vrot.slane %v891_v11, %v895_v9 }
 0x1fa   : > { %v811_v32 = vmax.f32 %v777_v25, 0.0  ;;  %v813_v38 = vmax.f32 %v787_v26, 0.0 }
 0x1fb   : > { %v810_v33 = vmax.f32 %v772_v29, 0.0  ;;  %v812_v34 = vmax.f32 %v782_v30, 0.0  ;;  %v1094_v35 = vpop.f32.mrb[2].mxu1 }
 0x1fc   : > { %v867_v37 = vmul.f32 %v834_v18, %v811_v32  ;;  %v791_v39 = vpop.f32.mrb[3].mxu1  ;;  %v797_v41 = vadd.f32 %v1094_v35, %v693_v21  ;;  %v869_v48 = vmul.f32 %v844_v22, %v813_v38 }
 0x1fd   : > { %v866_v40 = vmul.f32 %v829_v17, %v810_v33  ;;  %v792_v42 = vadd.f32 %v791_v39, %v688_v19  ;;  %v868_v44 = vmul.f32 %v839_v20, %v812_v34 }
 0x1fe   : > { %v815_v51 = vmax.f32 %v797_v41, 0.0 }
 0x1ff   : > { %v874_v43 = vadd.f32 %v867_v37, %v866_v40  ;;  %v814_v45 = vmax.f32 %v792_v42, 0.0  ;;  %v1097_v46 = vpop.f32.mrb[4].mxu1 }
 0x200   : > { %v801_v49 = vpop.f32.mrb[5].mxu1  ;;  %v807_v52 = vadd.f32 %v1097_v46, %v703_v47  ;;  %v871_v58 = vmul.f32 %v854_v54, %v815_v51 }
 0x201   : > { %v875_v50 = vadd.f32 %v874_v43, %v868_v44  ;;  %v802_v53 = vadd.f32 %v801_v49, %v698_v31  ;;  %v870_v55 = vmul.f32 %v849_v36, %v814_v45 }
 0x202   : > { %v817_v60 = vmax.f32 %v807_v52, 0.0 }
 0x203   : > { %v876_v56 = vadd.f32 %v875_v50, %v869_v48  ;;  %v816_v57 = vmax.f32 %v802_v53, 0.0 }
 0x204   : > { %v873_v1 = vmul.f32 %v864_v0, %v817_v60 }
 0x205   : > { %v877_v59 = vadd.f32 %v876_v56, %v870_v55  ;;  %v872_v62 = vmul.f32 %v859_v61, %v816_v57 }
 0x207   : > { %v878_v63 = vadd.f32 %v877_v59, %v871_v58 }
 0x209   : > { %v879_v2 = vadd.f32 %v878_v63, %v872_v62 }
 0x20b   : > { %v880_v4 = vadd.f32 %v879_v2, %v873_v1 }
 0x20d   : > { %v881_v5 = vrot.slane %v880_v4, 4 }
 0x20f   : > { %v882_v7 = vadd.f32 %v881_v5, %v880_v4 }
 0x211   : > { %v883_v8 = vrot.slane %v882_v7, 2 }
 0x213   : > { %v884_v10 = vadd.f32 %v883_v8, %v882_v7 }
 0x215   : > { %v885_v12 = vrot.slane %v884_v10, 1 }
 0x217   : > { %v886_v14 = vadd.f32 %v885_v12, %v884_v10 }
 0x219   : > { %v897_v15 = vadd.f32 %v896_v13, %v886_v14 }
 0x21b   : > { %898 = vst [vmem:[%s322_s20] sm:$0x1] %v897_v15 }
 0x21c PF: > { %p16_p9 = scmp.ge.s32.totalorder %s1266_s29, 5   ;;  %s1495_s26 = smov %s1199_s27 }
 0x21d   : > { %s1496_s27 = smov %s1275_s9  ;;  %s1497_s28 = smov %s1266_s29 }
 0x21e   :  { %18 = sbr.rel (!%p16_p9) target bundleno = 5 (0x5), region = 121 }

</bundles_post_ra>
